<compile_context>
chip_gen: v6e
topology: v6e:2x2x1
jax: 0.10.0
libtpu: 0.0.40
codegen_flags: <defaults>
</compile_context>

<pallas_src>
import jax
import jax.numpy as jnp
from jax import lax
from jax.experimental import pallas as pl
from jax.experimental.pallas import tpu as pltpu

DIM_ACTION = 18
DIM_BODY = 70
DIM_EX = 250
OFFSET_BODY = DIM_BODY
OFFSET_EX = OFFSET_BODY + DIM_EX          # 320
PAD_IN = 384                              # padded input width (multiple of 128)

LN_EPS = 1e-6
NEG_SLOPE = 0.2

# Row offsets into the packed [896, 128] bf16 weight block.
R_E2, R_H2A, R_H2B, R_H3, R_H4, R_H5 = 0, 128, 384, 512, 640, 768

# Row layout of the packed [8, 256] f32 bias block (gamma/beta already folded):
#  0: b_h1(256)  1: b_e1(128)  2: b_e2'(128)  3: b_h2'(128)
#  4: b_h3'(128) 5: b_h4'(128) 6: b_h5'(18, zero-padded)  7: pad


def actor_kernel(x_ref, w_in_ref, wbig_ref, vec_ref, out_ref):
    bf = jnp.bfloat16
    f32 = jnp.float32

    def bias(i, n):
        # static, lane-aligned [1, n] slice of the packed bias block
        return vec_ref[i:i + 1, :n]

    def lrelu(v):
        return jnp.maximum(v, NEG_SLOPE * v)          # 2 VPU ops, no select

    def ln(v):
        # torch LayerNorm (unbiased std) with gamma/beta pre-folded into the
        # next layer's weights.  s1/s2 are independent reductions; single
        # rsqrt on the EUP (eps on var instead of std; diff ~1e-6).
        n = v.shape[-1]
        s1 = jnp.sum(v, axis=-1, keepdims=True)
        s2 = jnp.sum(v * v, axis=-1, keepdims=True)
        mean = s1 * (1.0 / n)
        var = (s2 - s1 * mean) * (1.0 / (n - 1))
        inv = lax.rsqrt(var + LN_EPS)
        return (v - mean) * inv

    # ---- first layers: one block-diagonal MXU pass [B,384] @ [384,384] ----
    pre = jnp.dot(x_ref[...].astype(bf), w_in_ref[...],
                  preferred_element_type=f32)          # [B, 384]
    h1 = ln(lrelu(pre[:, :256] + bias(0, 256)))        # body branch  [B, 256]
    e = ln(lrelu(pre[:, 256:384] + bias(1, 128)))      # extero branch [B, 128]

    # ---- extero2 ----
    e = ln(lrelu(jnp.dot(e.astype(bf), wbig_ref[R_E2:R_E2 + 128, :],
                         preferred_element_type=f32) + bias(2, 128)))

    # ---- trunk (concat-free hidden2: h1 @ W2[:256] + e @ W2[256:]) ----
    h = (jnp.dot(h1.astype(bf), wbig_ref[R_H2A:R_H2A + 256, :],
                 preferred_element_type=f32)
         + jnp.dot(e.astype(bf), wbig_ref[R_H2B:R_H2B + 128, :],
                   preferred_element_type=f32))
    h = ln(lrelu(h + bias(3, 128)))

    h = ln(lrelu(jnp.dot(h.astype(bf), wbig_ref[R_H3:R_H3 + 128, :],
                         preferred_element_type=f32) + bias(4, 128)))
    h = ln(lrelu(jnp.dot(h.astype(bf), wbig_ref[R_H4:R_H4 + 128, :],
                         preferred_element_type=f32) + bias(5, 128)))

    # ---- final layer, padded to 128 lanes (lane-dense store) ----
    o = jnp.dot(h.astype(bf), wbig_ref[R_H5:R_H5 + 128, :],
                preferred_element_type=f32) + bias(6, 128)
    out_ref[...] = jnp.tanh(o) * 0.5 + 0.5


def pack_params(params):
    """Fold LN gamma/beta into the following layer and pack kernel inputs."""
    (w_h1, b_h1, g1, be1,
     w_e1, b_e1, ge1, bee1,
     w_e2, b_e2, ge2, bee2,
     w_h2, b_h2, g2, be2,
     w_h3, b_h3, g3, be3,
     w_h4, b_h4, g4, be4,
     w_h5, b_h5) = params

    # ---- gamma/beta fold (in f32, cast to bf16 only afterwards) ----
    # LN output y = gamma*z + beta feeds a matmul: y@W + b = z@(diag(g)W) + (beta@W + b)
    w_e2f = ge1[:, None] * w_e2
    b_e2f = b_e2 + bee1 @ w_e2
    w_h2a = g1[:, None] * w_h2[:256]
    w_h2b = ge2[:, None] * w_h2[256:]
    b_h2f = b_h2 + be1 @ w_h2[:256] + bee2 @ w_h2[256:]
    w_h3f = g2[:, None] * w_h3
    b_h3f = b_h3 + be2 @ w_h3
    w_h4f = g3[:, None] * w_h4
    b_h4f = b_h4 + be3 @ w_h4
    w_h5f = g4[:, None] * w_h5
    b_h5f = b_h5 + be4 @ w_h5

    # ---- block-diagonal first layer: x_pad[B,384] @ w_in[384,384] ----
    # rows 0:70   -> hidden1 weights into output lanes   0:256
    # rows 70:320 -> extero1 weights into output lanes 256:384
    w_in = jnp.zeros((PAD_IN, 384), jnp.float32)
    w_in = w_in.at[:DIM_BODY, :256].set(w_h1)
    w_in = w_in.at[OFFSET_BODY:OFFSET_EX, 256:].set(w_e1)
    w_in = w_in.astype(jnp.bfloat16)                              # [384, 384]

    # ---- packed 128-lane weights ----
    w_h5_pad = jnp.pad(w_h5f, ((0, 0), (0, 128 - DIM_ACTION)))    # [128, 128]
    wbig = jnp.concatenate([
        w_e2f,      # rows   0:128
        w_h2a,      # rows 128:384
        w_h2b,      # rows 384:512
        w_h3f,      # rows 512:640
        w_h4f,      # rows 640:768
        w_h5_pad,   # rows 768:896
    ], axis=0).astype(jnp.bfloat16)                               # [896, 128]

    # ---- packed (folded) biases: 7 rows, padded to [8, 256] ----
    def pad_row(v):
        v = v.reshape(-1)
        return jnp.pad(v, (0, 256 - v.shape[0]))

    vec = jnp.stack([pad_row(v) for v in
                     (b_h1, b_e1, b_e2f, b_h2f, b_h3f, b_h4f, b_h5f)], axis=0)
    vec = jnp.pad(vec, ((0, 1), (0, 0))).astype(jnp.float32)      # [8, 256]

    return w_in, wbig, vec


@jax.jit
def actor_forward(x, w_in, wbig, vec):
    B = x.shape[0]
    # Zero-pad the 320 input features to 384 (multiple of 128) once; the
    # extra columns multiply zero weight rows.
    x_pad = jnp.pad(x, ((0, 0), (0, PAD_IN - OFFSET_EX)))
    vmem = pl.BlockSpec(memory_space=pltpu.MemorySpace.VMEM)
    out = pl.pallas_call(
        actor_kernel,
        out_shape=jax.ShapeDtypeStruct((B, 128), jnp.float32),
        in_specs=[vmem] * 4,
        out_specs=vmem,
    )(x_pad, w_in, wbig, vec)
    return out[:, :DIM_ACTION]


def init_params(key):
    """torch.nn.Linear-style init; weights pre-transposed to [in, out].
    LN gamma/beta are perturbed away from (1, 0) so the fold path is actually
    exercised by the correctness check."""
    def linear(k, fan_in, fan_out):
        k1, k2 = jax.random.split(k)
        bound = 1.0 / (fan_in ** 0.5)
        w = jax.random.uniform(k1, (fan_in, fan_out), jnp.float32, -bound, bound)
        b = jax.random.uniform(k2, (fan_out,), jnp.float32, -bound, bound)
        return w, b

    def ln_p(k, features):
        k1, k2 = jax.random.split(k)
        g = 1.0 + 0.1 * jax.random.uniform(k1, (features,), jnp.float32, -1.0, 1.0)
        b = 0.1 * jax.random.uniform(k2, (features,), jnp.float32, -1.0, 1.0)
        return g, b

    keys = jax.random.split(key, 13)
    w_h1, b_h1 = linear(keys[0], DIM_BODY, 256);  g1, be1 = ln_p(keys[7], 256)
    w_e1, b_e1 = linear(keys[1], DIM_EX, 128);    ge1, bee1 = ln_p(keys[8], 128)
    w_e2, b_e2 = linear(keys[2], 128, 128);       ge2, bee2 = ln_p(keys[9], 128)
    w_h2, b_h2 = linear(keys[3], 256 + 128, 128); g2, be2 = ln_p(keys[10], 128)
    w_h3, b_h3 = linear(keys[4], 128, 128);       g3, be3 = ln_p(keys[11], 128)
    w_h4, b_h4 = linear(keys[5], 128, 128);       g4, be4 = ln_p(keys[12], 128)
    w_h5, b_h5 = linear(keys[6], 128, DIM_ACTION)
    return [w_h1, b_h1, g1, be1,
            w_e1, b_e1, ge1, bee1,
            w_e2, b_e2, ge2, bee2,
            w_h2, b_h2, g2, be2,
            w_h3, b_h3, g3, be3,
            w_h4, b_h4, g4, be4,
            w_h5, b_h5]


def actor_reference(x, p):
    """Pure-JAX f32 reference of the torch module's forward pass (unfolded)."""
    (w_h1, b_h1, g1, be1,
     w_e1, b_e1, ge1, bee1,
     w_e2, b_e2, ge2, bee2,
     w_h2, b_h2, g2, be2,
     w_h3, b_h3, g3, be3,
     w_h4, b_h4, g4, be4,
     w_h5, b_h5) = p

    def lrelu(v):
        return jnp.where(v > 0, v, NEG_SLOPE * v)

    def ln(v, g, b):
        n = v.shape[-1]
        mean = jnp.mean(v, axis=-1, keepdims=True)
        var = jnp.sum((v - mean) ** 2, axis=-1, keepdims=True) / (n - 1)
        return g * (v - mean) / (jnp.sqrt(var) + LN_EPS) + b

    x1, x2 = x[:, :OFFSET_BODY], x[:, OFFSET_BODY:OFFSET_EX]
    h1 = ln(lrelu(x1 @ w_h1 + b_h1), g1, be1)
    e = ln(lrelu(x2 @ w_e1 + b_e1), ge1, bee1)
    e = ln(lrelu(e @ w_e2 + b_e2), ge2, bee2)
    h = jnp.concatenate([h1, e], axis=1)
    h = ln(lrelu(h @ w_h2 + b_h2), g2, be2)
    h = ln(lrelu(h @ w_h3 + b_h3), g3, be3)
    h = ln(lrelu(h @ w_h4 + b_h4), g4, be4)
    return jnp.tanh(h @ w_h5 + b_h5) * 0.5 + 0.5


if __name__ == "__main__":
    key = jax.random.PRNGKey(0)
    k_param, k_x = jax.random.split(key)
    params = init_params(k_param)
    packed = pack_params(params)

    B = 8
    x = jax.random.normal(k_x, (B, OFFSET_EX), dtype=jnp.float32)  # [8, 320]

    out = jax.block_until_ready(actor_forward(x, *packed))
    ref = actor_reference(x, params)

    assert out.shape == (B, DIM_ACTION)
    # Tolerance covers bf16 matmul inputs, the one-pass variance, and
    # rsqrt(var+eps) vs exact 1/(std+eps); outputs live in [0, 1].
    max_err = float(jnp.max(jnp.abs(out - ref)))
    assert max_err < 3e-2, max_err

    print("KERNEL_OK")
</pallas_src>

<mosaic_0001>
module attributes {stable_mosaic.version = 11 : i64} {
  func.func @actor_kernel(%arg0: memref<8x384xf32, #tpu.memory_space<vmem>>, %arg1: memref<384x384xbf16, #tpu.memory_space<vmem>>, %arg2: memref<896x128xbf16, #tpu.memory_space<vmem>>, %arg3: memref<8x256xf32, #tpu.memory_space<vmem>>, %arg4: memref<8x128xf32, #tpu.memory_space<vmem>>) attributes {dimension_semantics = [], scalar_prefetch = 0 : i64, scratch_operands = 0 : i64, tpu.core_type = #tpu.core_type<tc>} {
    %c0 = arith.constant 0 : index
    %c0_0 = arith.constant 0 : index
    %0 = vector.load %arg0[%c0, %c0_0] : memref<8x384xf32, #tpu.memory_space<vmem>>, vector<8x384xf32>
    %1 = arith.truncf %0 : vector<8x384xf32> to vector<8x384xbf16>
    %c0_1 = arith.constant 0 : index
    %c0_2 = arith.constant 0 : index
    %2 = vector.load %arg1[%c0_1, %c0_2] : memref<384x384xbf16, #tpu.memory_space<vmem>>, vector<384x384xbf16>
    %cst = arith.constant dense<0.000000e+00> : vector<8x384xf32>
    %3 = tpu.matmul %1, %2, %cst {dimension_numbers = #tpu.dot_dimension_numbers<[1], [0], [0], [1], [0, 0, 1, 1], [], []>} : vector<8x384xbf16>, vector<384x384xbf16>, vector<8x384xf32> -> vector<8x384xf32>
    %4 = vector.extract_strided_slice %3 {offsets = [0, 0], sizes = [8, 256], strides = [1, 1]} : vector<8x384xf32> to vector<8x256xf32>
    %c0_3 = arith.constant 0 : index
    %c0_4 = arith.constant 0 : index
    %5 = vector.load %arg3[%c0_3, %c0_4] : memref<8x256xf32, #tpu.memory_space<vmem>>, vector<1x256xf32>
    %6 = vector.broadcast %5 : vector<1x256xf32> to vector<8x256xf32>
    %7 = arith.addf %4, %6 : vector<8x256xf32>
    %cst_5 = arith.constant 2.000000e-01 : f32
    %8 = vector.broadcast %cst_5 : f32 to vector<8x256xf32>
    %9 = arith.mulf %8, %7 : vector<8x256xf32>
    %10 = arith.maximumf %7, %9 : vector<8x256xf32>
    %cst_6 = arith.constant dense<0.000000e+00> : vector<8xf32>
    %11 = vector.multi_reduction <add>, %10, %cst_6 [1] : vector<8x256xf32> to vector<8xf32>
    %12 = vector.shape_cast %11 : vector<8xf32> to vector<8x1xf32>
    %13 = arith.mulf %10, %10 : vector<8x256xf32>
    %cst_7 = arith.constant dense<0.000000e+00> : vector<8xf32>
    %14 = vector.multi_reduction <add>, %13, %cst_7 [1] : vector<8x256xf32> to vector<8xf32>
    %15 = vector.shape_cast %14 : vector<8xf32> to vector<8x1xf32>
    %cst_8 = arith.constant 3.906250e-03 : f32
    %16 = vector.broadcast %cst_8 : f32 to vector<8x1xf32>
    %17 = arith.mulf %12, %16 : vector<8x1xf32>
    %18 = arith.mulf %12, %17 : vector<8x1xf32>
    %19 = arith.subf %15, %18 : vector<8x1xf32>
    %cst_9 = arith.constant 0.00392156886 : f32
    %20 = vector.broadcast %cst_9 : f32 to vector<8x1xf32>
    %21 = arith.mulf %19, %20 : vector<8x1xf32>
    %cst_10 = arith.constant 9.99999997E-7 : f32
    %22 = vector.broadcast %cst_10 : f32 to vector<8x1xf32>
    %23 = arith.addf %21, %22 : vector<8x1xf32>
    %24 = math.rsqrt %23 : vector<8x1xf32>
    %25 = vector.broadcast %17 : vector<8x1xf32> to vector<8x256xf32>
    %26 = arith.subf %10, %25 : vector<8x256xf32>
    %27 = vector.broadcast %24 : vector<8x1xf32> to vector<8x256xf32>
    %28 = arith.mulf %26, %27 : vector<8x256xf32>
    %29 = vector.extract_strided_slice %3 {offsets = [0, 256], sizes = [8, 128], strides = [1, 1]} : vector<8x384xf32> to vector<8x128xf32>
    %c1 = arith.constant 1 : index
    %c0_11 = arith.constant 0 : index
    %30 = vector.load %arg3[%c1, %c0_11] : memref<8x256xf32, #tpu.memory_space<vmem>>, vector<1x128xf32>
    %31 = vector.broadcast %30 : vector<1x128xf32> to vector<8x128xf32>
    %32 = arith.addf %29, %31 : vector<8x128xf32>
    %cst_12 = arith.constant 2.000000e-01 : f32
    %33 = vector.broadcast %cst_12 : f32 to vector<8x128xf32>
    %34 = arith.mulf %33, %32 : vector<8x128xf32>
    %35 = arith.maximumf %32, %34 : vector<8x128xf32>
    %cst_13 = arith.constant dense<0.000000e+00> : vector<8xf32>
    %36 = vector.multi_reduction <add>, %35, %cst_13 [1] : vector<8x128xf32> to vector<8xf32>
    %37 = vector.shape_cast %36 : vector<8xf32> to vector<8x1xf32>
    %38 = arith.mulf %35, %35 : vector<8x128xf32>
    %cst_14 = arith.constant dense<0.000000e+00> : vector<8xf32>
    %39 = vector.multi_reduction <add>, %38, %cst_14 [1] : vector<8x128xf32> to vector<8xf32>
    %40 = vector.shape_cast %39 : vector<8xf32> to vector<8x1xf32>
    %cst_15 = arith.constant 7.812500e-03 : f32
    %41 = vector.broadcast %cst_15 : f32 to vector<8x1xf32>
    %42 = arith.mulf %37, %41 : vector<8x1xf32>
    %43 = arith.mulf %37, %42 : vector<8x1xf32>
    %44 = arith.subf %40, %43 : vector<8x1xf32>
    %cst_16 = arith.constant 0.00787401571 : f32
    %45 = vector.broadcast %cst_16 : f32 to vector<8x1xf32>
    %46 = arith.mulf %44, %45 : vector<8x1xf32>
    %cst_17 = arith.constant 9.99999997E-7 : f32
    %47 = vector.broadcast %cst_17 : f32 to vector<8x1xf32>
    %48 = arith.addf %46, %47 : vector<8x1xf32>
    %49 = math.rsqrt %48 : vector<8x1xf32>
    %50 = vector.broadcast %42 : vector<8x1xf32> to vector<8x128xf32>
    %51 = arith.subf %35, %50 : vector<8x128xf32>
    %52 = vector.broadcast %49 : vector<8x1xf32> to vector<8x128xf32>
    %53 = arith.mulf %51, %52 : vector<8x128xf32>
    %54 = arith.truncf %53 : vector<8x128xf32> to vector<8x128xbf16>
    %c0_18 = arith.constant 0 : index
    %c0_19 = arith.constant 0 : index
    %55 = vector.load %arg2[%c0_18, %c0_19] : memref<896x128xbf16, #tpu.memory_space<vmem>>, vector<128x128xbf16>
    %cst_20 = arith.constant dense<0.000000e+00> : vector<8x128xf32>
    %56 = tpu.matmul %54, %55, %cst_20 {dimension_numbers = #tpu.dot_dimension_numbers<[1], [0], [0], [1], [0, 0, 1, 1], [], []>} : vector<8x128xbf16>, vector<128x128xbf16>, vector<8x128xf32> -> vector<8x128xf32>
    %c2 = arith.constant 2 : index
    %c0_21 = arith.constant 0 : index
    %57 = vector.load %arg3[%c2, %c0_21] : memref<8x256xf32, #tpu.memory_space<vmem>>, vector<1x128xf32>
    %58 = vector.broadcast %57 : vector<1x128xf32> to vector<8x128xf32>
    %59 = arith.addf %56, %58 : vector<8x128xf32>
    %cst_22 = arith.constant 2.000000e-01 : f32
    %60 = vector.broadcast %cst_22 : f32 to vector<8x128xf32>
    %61 = arith.mulf %60, %59 : vector<8x128xf32>
    %62 = arith.maximumf %59, %61 : vector<8x128xf32>
    %cst_23 = arith.constant dense<0.000000e+00> : vector<8xf32>
    %63 = vector.multi_reduction <add>, %62, %cst_23 [1] : vector<8x128xf32> to vector<8xf32>
    %64 = vector.shape_cast %63 : vector<8xf32> to vector<8x1xf32>
    %65 = arith.mulf %62, %62 : vector<8x128xf32>
    %cst_24 = arith.constant dense<0.000000e+00> : vector<8xf32>
    %66 = vector.multi_reduction <add>, %65, %cst_24 [1] : vector<8x128xf32> to vector<8xf32>
    %67 = vector.shape_cast %66 : vector<8xf32> to vector<8x1xf32>
    %cst_25 = arith.constant 7.812500e-03 : f32
    %68 = vector.broadcast %cst_25 : f32 to vector<8x1xf32>
    %69 = arith.mulf %64, %68 : vector<8x1xf32>
    %70 = arith.mulf %64, %69 : vector<8x1xf32>
    %71 = arith.subf %67, %70 : vector<8x1xf32>
    %cst_26 = arith.constant 0.00787401571 : f32
    %72 = vector.broadcast %cst_26 : f32 to vector<8x1xf32>
    %73 = arith.mulf %71, %72 : vector<8x1xf32>
    %cst_27 = arith.constant 9.99999997E-7 : f32
    %74 = vector.broadcast %cst_27 : f32 to vector<8x1xf32>
    %75 = arith.addf %73, %74 : vector<8x1xf32>
    %76 = math.rsqrt %75 : vector<8x1xf32>
    %77 = vector.broadcast %69 : vector<8x1xf32> to vector<8x128xf32>
    %78 = arith.subf %62, %77 : vector<8x128xf32>
    %79 = vector.broadcast %76 : vector<8x1xf32> to vector<8x128xf32>
    %80 = arith.mulf %78, %79 : vector<8x128xf32>
    %81 = arith.truncf %28 : vector<8x256xf32> to vector<8x256xbf16>
    %c128 = arith.constant 128 : index
    %c0_28 = arith.constant 0 : index
    %82 = vector.load %arg2[%c128, %c0_28] : memref<896x128xbf16, #tpu.memory_space<vmem>>, vector<256x128xbf16>
    %cst_29 = arith.constant dense<0.000000e+00> : vector<8x128xf32>
    %83 = tpu.matmul %81, %82, %cst_29 {dimension_numbers = #tpu.dot_dimension_numbers<[1], [0], [0], [1], [0, 0, 1, 1], [], []>} : vector<8x256xbf16>, vector<256x128xbf16>, vector<8x128xf32> -> vector<8x128xf32>
    %84 = arith.truncf %80 : vector<8x128xf32> to vector<8x128xbf16>
    %c384 = arith.constant 384 : index
    %c0_30 = arith.constant 0 : index
    %85 = vector.load %arg2[%c384, %c0_30] : memref<896x128xbf16, #tpu.memory_space<vmem>>, vector<128x128xbf16>
    %cst_31 = arith.constant dense<0.000000e+00> : vector<8x128xf32>
    %86 = tpu.matmul %84, %85, %cst_31 {dimension_numbers = #tpu.dot_dimension_numbers<[1], [0], [0], [1], [0, 0, 1, 1], [], []>} : vector<8x128xbf16>, vector<128x128xbf16>, vector<8x128xf32> -> vector<8x128xf32>
    %87 = arith.addf %83, %86 : vector<8x128xf32>
    %c3 = arith.constant 3 : index
    %c0_32 = arith.constant 0 : index
    %88 = vector.load %arg3[%c3, %c0_32] : memref<8x256xf32, #tpu.memory_space<vmem>>, vector<1x128xf32>
    %89 = vector.broadcast %88 : vector<1x128xf32> to vector<8x128xf32>
    %90 = arith.addf %87, %89 : vector<8x128xf32>
    %cst_33 = arith.constant 2.000000e-01 : f32
    %91 = vector.broadcast %cst_33 : f32 to vector<8x128xf32>
    %92 = arith.mulf %91, %90 : vector<8x128xf32>
    %93 = arith.maximumf %90, %92 : vector<8x128xf32>
    %cst_34 = arith.constant dense<0.000000e+00> : vector<8xf32>
    %94 = vector.multi_reduction <add>, %93, %cst_34 [1] : vector<8x128xf32> to vector<8xf32>
    %95 = vector.shape_cast %94 : vector<8xf32> to vector<8x1xf32>
    %96 = arith.mulf %93, %93 : vector<8x128xf32>
    %cst_35 = arith.constant dense<0.000000e+00> : vector<8xf32>
    %97 = vector.multi_reduction <add>, %96, %cst_35 [1] : vector<8x128xf32> to vector<8xf32>
    %98 = vector.shape_cast %97 : vector<8xf32> to vector<8x1xf32>
    %cst_36 = arith.constant 7.812500e-03 : f32
    %99 = vector.broadcast %cst_36 : f32 to vector<8x1xf32>
    %100 = arith.mulf %95, %99 : vector<8x1xf32>
    %101 = arith.mulf %95, %100 : vector<8x1xf32>
    %102 = arith.subf %98, %101 : vector<8x1xf32>
    %cst_37 = arith.constant 0.00787401571 : f32
    %103 = vector.broadcast %cst_37 : f32 to vector<8x1xf32>
    %104 = arith.mulf %102, %103 : vector<8x1xf32>
    %cst_38 = arith.constant 9.99999997E-7 : f32
    %105 = vector.broadcast %cst_38 : f32 to vector<8x1xf32>
    %106 = arith.addf %104, %105 : vector<8x1xf32>
    %107 = math.rsqrt %106 : vector<8x1xf32>
    %108 = vector.broadcast %100 : vector<8x1xf32> to vector<8x128xf32>
    %109 = arith.subf %93, %108 : vector<8x128xf32>
    %110 = vector.broadcast %107 : vector<8x1xf32> to vector<8x128xf32>
    %111 = arith.mulf %109, %110 : vector<8x128xf32>
    %112 = arith.truncf %111 : vector<8x128xf32> to vector<8x128xbf16>
    %c512 = arith.constant 512 : index
    %c0_39 = arith.constant 0 : index
    %113 = vector.load %arg2[%c512, %c0_39] : memref<896x128xbf16, #tpu.memory_space<vmem>>, vector<128x128xbf16>
    %cst_40 = arith.constant dense<0.000000e+00> : vector<8x128xf32>
    %114 = tpu.matmul %112, %113, %cst_40 {dimension_numbers = #tpu.dot_dimension_numbers<[1], [0], [0], [1], [0, 0, 1, 1], [], []>} : vector<8x128xbf16>, vector<128x128xbf16>, vector<8x128xf32> -> vector<8x128xf32>
    %c4 = arith.constant 4 : index
    %c0_41 = arith.constant 0 : index
    %115 = vector.load %arg3[%c4, %c0_41] : memref<8x256xf32, #tpu.memory_space<vmem>>, vector<1x128xf32>
    %116 = vector.broadcast %115 : vector<1x128xf32> to vector<8x128xf32>
    %117 = arith.addf %114, %116 : vector<8x128xf32>
    %cst_42 = arith.constant 2.000000e-01 : f32
    %118 = vector.broadcast %cst_42 : f32 to vector<8x128xf32>
    %119 = arith.mulf %118, %117 : vector<8x128xf32>
    %120 = arith.maximumf %117, %119 : vector<8x128xf32>
    %cst_43 = arith.constant dense<0.000000e+00> : vector<8xf32>
    %121 = vector.multi_reduction <add>, %120, %cst_43 [1] : vector<8x128xf32> to vector<8xf32>
    %122 = vector.shape_cast %121 : vector<8xf32> to vector<8x1xf32>
    %123 = arith.mulf %120, %120 : vector<8x128xf32>
    %cst_44 = arith.constant dense<0.000000e+00> : vector<8xf32>
    %124 = vector.multi_reduction <add>, %123, %cst_44 [1] : vector<8x128xf32> to vector<8xf32>
    %125 = vector.shape_cast %124 : vector<8xf32> to vector<8x1xf32>
    %cst_45 = arith.constant 7.812500e-03 : f32
    %126 = vector.broadcast %cst_45 : f32 to vector<8x1xf32>
    %127 = arith.mulf %122, %126 : vector<8x1xf32>
    %128 = arith.mulf %122, %127 : vector<8x1xf32>
    %129 = arith.subf %125, %128 : vector<8x1xf32>
    %cst_46 = arith.constant 0.00787401571 : f32
    %130 = vector.broadcast %cst_46 : f32 to vector<8x1xf32>
    %131 = arith.mulf %129, %130 : vector<8x1xf32>
    %cst_47 = arith.constant 9.99999997E-7 : f32
    %132 = vector.broadcast %cst_47 : f32 to vector<8x1xf32>
    %133 = arith.addf %131, %132 : vector<8x1xf32>
    %134 = math.rsqrt %133 : vector<8x1xf32>
    %135 = vector.broadcast %127 : vector<8x1xf32> to vector<8x128xf32>
    %136 = arith.subf %120, %135 : vector<8x128xf32>
    %137 = vector.broadcast %134 : vector<8x1xf32> to vector<8x128xf32>
    %138 = arith.mulf %136, %137 : vector<8x128xf32>
    %139 = arith.truncf %138 : vector<8x128xf32> to vector<8x128xbf16>
    %c640 = arith.constant 640 : index
    %c0_48 = arith.constant 0 : index
    %140 = vector.load %arg2[%c640, %c0_48] : memref<896x128xbf16, #tpu.memory_space<vmem>>, vector<128x128xbf16>
    %cst_49 = arith.constant dense<0.000000e+00> : vector<8x128xf32>
    %141 = tpu.matmul %139, %140, %cst_49 {dimension_numbers = #tpu.dot_dimension_numbers<[1], [0], [0], [1], [0, 0, 1, 1], [], []>} : vector<8x128xbf16>, vector<128x128xbf16>, vector<8x128xf32> -> vector<8x128xf32>
    %c5 = arith.constant 5 : index
    %c0_50 = arith.constant 0 : index
    %142 = vector.load %arg3[%c5, %c0_50] : memref<8x256xf32, #tpu.memory_space<vmem>>, vector<1x128xf32>
    %143 = vector.broadcast %142 : vector<1x128xf32> to vector<8x128xf32>
    %144 = arith.addf %141, %143 : vector<8x128xf32>
    %cst_51 = arith.constant 2.000000e-01 : f32
    %145 = vector.broadcast %cst_51 : f32 to vector<8x128xf32>
    %146 = arith.mulf %145, %144 : vector<8x128xf32>
    %147 = arith.maximumf %144, %146 : vector<8x128xf32>
    %cst_52 = arith.constant dense<0.000000e+00> : vector<8xf32>
    %148 = vector.multi_reduction <add>, %147, %cst_52 [1] : vector<8x128xf32> to vector<8xf32>
    %149 = vector.shape_cast %148 : vector<8xf32> to vector<8x1xf32>
    %150 = arith.mulf %147, %147 : vector<8x128xf32>
    %cst_53 = arith.constant dense<0.000000e+00> : vector<8xf32>
    %151 = vector.multi_reduction <add>, %150, %cst_53 [1] : vector<8x128xf32> to vector<8xf32>
    %152 = vector.shape_cast %151 : vector<8xf32> to vector<8x1xf32>
    %cst_54 = arith.constant 7.812500e-03 : f32
    %153 = vector.broadcast %cst_54 : f32 to vector<8x1xf32>
    %154 = arith.mulf %149, %153 : vector<8x1xf32>
    %155 = arith.mulf %149, %154 : vector<8x1xf32>
    %156 = arith.subf %152, %155 : vector<8x1xf32>
    %cst_55 = arith.constant 0.00787401571 : f32
    %157 = vector.broadcast %cst_55 : f32 to vector<8x1xf32>
    %158 = arith.mulf %156, %157 : vector<8x1xf32>
    %cst_56 = arith.constant 9.99999997E-7 : f32
    %159 = vector.broadcast %cst_56 : f32 to vector<8x1xf32>
    %160 = arith.addf %158, %159 : vector<8x1xf32>
    %161 = math.rsqrt %160 : vector<8x1xf32>
    %162 = vector.broadcast %154 : vector<8x1xf32> to vector<8x128xf32>
    %163 = arith.subf %147, %162 : vector<8x128xf32>
    %164 = vector.broadcast %161 : vector<8x1xf32> to vector<8x128xf32>
    %165 = arith.mulf %163, %164 : vector<8x128xf32>
    %166 = arith.truncf %165 : vector<8x128xf32> to vector<8x128xbf16>
    %c768 = arith.constant 768 : index
    %c0_57 = arith.constant 0 : index
    %167 = vector.load %arg2[%c768, %c0_57] : memref<896x128xbf16, #tpu.memory_space<vmem>>, vector<128x128xbf16>
    %cst_58 = arith.constant dense<0.000000e+00> : vector<8x128xf32>
    %168 = tpu.matmul %166, %167, %cst_58 {dimension_numbers = #tpu.dot_dimension_numbers<[1], [0], [0], [1], [0, 0, 1, 1], [], []>} : vector<8x128xbf16>, vector<128x128xbf16>, vector<8x128xf32> -> vector<8x128xf32>
    %c6 = arith.constant 6 : index
    %c0_59 = arith.constant 0 : index
    %169 = vector.load %arg3[%c6, %c0_59] : memref<8x256xf32, #tpu.memory_space<vmem>>, vector<1x128xf32>
    %170 = vector.broadcast %169 : vector<1x128xf32> to vector<8x128xf32>
    %171 = arith.addf %168, %170 : vector<8x128xf32>
    %172 = math.tanh %171 : vector<8x128xf32>
    %cst_60 = arith.constant 5.000000e-01 : f32
    %173 = vector.broadcast %cst_60 : f32 to vector<8x128xf32>
    %174 = arith.mulf %172, %173 : vector<8x128xf32>
    %cst_61 = arith.constant 5.000000e-01 : f32
    %175 = vector.broadcast %cst_61 : f32 to vector<8x128xf32>
    %176 = arith.addf %174, %175 : vector<8x128xf32>
    %c0_62 = arith.constant 0 : index
    %c0_63 = arith.constant 0 : index
    %177 = vector.load %arg4[%c0_62, %c0_63] : memref<8x128xf32, #tpu.memory_space<vmem>>, vector<8x128xf32>
    tpu.vector_store %arg4[%c0_62, %c0_63], %176 {strides = array<i32>} : memref<8x128xf32, #tpu.memory_space<vmem>>, vector<8x128xf32>,
    return
  }
}

</mosaic_0001>

<bundles_post_ra>
// kernel: actor_forward.1
= control target key start
LH: loop header
LB: loop body
LE: loop exit
PB: predicated region body
PF: predicated region fallthrough
CT: control target
= control target key end

     0   :  { %9 = vsyncpa [#allocation3], 0  ;;  %s2267_s0 = inlined_call_operand.vmem [shape: f32[8,384], index: 0, kind: input, shape index: {}]   ;;  %s2268_s1 = inlined_call_operand.hbm [shape: bf16[384,384], index: 1, kind: input, shape index: {}]   ;;  %s2269_s2 = inlined_call_operand.hbm [shape: bf16[896,128], index: 2, kind: input, shape index: {}]   ;;  %s2270_s3 = inlined_call_operand.vmem [shape: f32[8,256], index: 3, kind: input, shape index: {}]   ;;  %s2271_s4 = inlined_call_operand.hbm [shape: f32[8,128], index: 4, kind: output, shape index: {}]  }
   0x1   :  { %10 = vsyncpa [#allocation6], 0 }
   0x2   :  { %11 = vsyncpa [#allocation4], 0  ;;  %s2117_s15 = smov [#allocation2]  }
   0x3   :  { %s19_s16 = sshll.u32 %s2117_s15, 4  ;;  %s20_s16 = int_to_ptr.vmem [resolvable:$true] %s19_s16 }
   0x4   :  { %s2059_s17 = scalar_lea.vmem %s20_s16, 9216  ;;  %p2064_p1 = scmp.lt.s32.totalorder %s20_s16, %s20_s16 }
   0x5   :  { %p2060_p0 = scmp.ne.s32.totalorder %s20_s16, %s2059_s17  ;;  %p2065_p2 = scmp.lt.s32.totalorder %s2059_s17, %s2059_s17 }
   0x7   :  { %p2066_p3 = por %p2065_p2, %p2064_p1 }
   0x9   :  { %p2067_p4 = pnand %p2066_p3, %p2060_p0 }
   0xb   :  { %2070 = shalt.err (!%p2067_p4)
}
   0xc   :  { %s2118_s18 = smov 192   ;;  %s2119_s19 = smov 12  }
   0xd   :  { %25 = dma.hbm_to_vmem [thread:$0]  %s2268_s1, 9216, %s20_s16, [#allocation3], %s2118_s18, %s2118_s18, %s2119_s19  }
   0xe   :  { %s2120_s22 = smov [#allocation5]  }
   0xf   :  { %s31_s23 = sshll.u32 %s2120_s22, 4  ;;  %s32_s23 = int_to_ptr.vmem [resolvable:$true] %s31_s23 }
  0x10   :  { %s2079_s24 = scalar_lea.vmem %s32_s23, 7168  ;;  %p2084_p6 = scmp.lt.s32.totalorder %s32_s23, %s32_s23 }
  0x11   :  { %p2080_p5 = scmp.ne.s32.totalorder %s32_s23, %s2079_s24  ;;  %p2085_p7 = scmp.lt.s32.totalorder %s2079_s24, %s2079_s24 }
  0x13   :  { %p2086_p8 = por %p2085_p7, %p2084_p6 }
  0x15   :  { %p2087_p9 = pnand %p2086_p8, %p2080_p5 }
  0x17   :  { %2090 = shalt.err (!%p2087_p9)
}
  0x18   :  { %s2121_s25 = smov 64   ;;  %s2122_s26 = smov 4  }
  0x19   :  { %37 = dma.hbm_to_vmem [thread:$0]  %s2269_s2, 7168, %s32_s23, [#allocation6], %s2121_s25, %s2121_s25, %s2122_s26  }
  0x1a   :  { %2111 = dma.done.wait [#allocation3], 9216  }
  0x1b   :  { %2112 = vsyncadd [#allocation3], 4294958080 }
  0x1c   :  { %2113 = dma.done.wait [#allocation6], 7168  }
  0x1d   :  { %2114 = vsyncadd [#allocation6], 4294960128  ;;  %v2123_v0 = vmov 0   ;;  %v1885_v1 = vld [vmem:[#allocation2 + $0xac] ss:$12 sps:$4 sm:$0xff]   ;;  %v49_v38 = vld [vmem:[%s2267_s0 + $0x10] sm:$0xff] }
  0x1e   :  { %606 = vmatprep.mubr.bf16.mxu1 %v2123_v0  ;;  %v1887_v2 = vld [vmem:[#allocation2 + $0xa8] ss:$12 sps:$4 sm:$0xff]   ;;  %533 = vmatprep.subr.bf16.mxu0 %v1885_v1  ;;  %v1890_v4 = vld [vmem:[#allocation2 + $0x90] ss:$12 sps:$4 sm:$0xff]   ;;  %v1893_v6 = vld [vmem:[#allocation2 + $0x78] ss:$12 sps:$4 sm:$0xff]   ;;  %v2164_v43 = vpack.c.bf16 %v49_v38, %v49_v38 }
  0x1f   :  { %v1888_v3 = vld [vmem:[#allocation2 + $0x94] ss:$12 sps:$4 sm:$0xff]   ;;  %534 = vmatpush1.bf16.msra.mxu0 %v1887_v2  ;;  %v1891_v5 = vld [vmem:[#allocation2 + $0x7c] ss:$12 sps:$4 sm:$0xff]   ;;  %v1894_v7 = vld [vmem:[#allocation2 + $0x64] ss:$12 sps:$4 sm:$0xff]  }
  0x20   :  { %535 = vmatprep.subr.bf16.mxu0 %v1888_v3  ;;  %v1903_v8 = vld [vmem:[#allocation2 + $0x22c] ss:$12 sps:$4 sm:$0xff]   ;;  %v1905_v9 = vld [vmem:[#allocation2 + $0x228] ss:$12 sps:$4 sm:$0xff]   ;;  %v1911_v12 = vld [vmem:[#allocation2 + $0x210] ss:$12 sps:$4 sm:$0xff]  }
  0x21   :  { %v1896_v10 = vld [vmem:[#allocation2 + $0x60] ss:$12 sps:$4 sm:$0xff]   ;;  %574 = vmatprep.subr.bf16.mxu1 %v1903_v8  ;;  %v1899_v14 = vld [vmem:[#allocation2 + $0x48] ss:$12 sps:$4 sm:$0xff]   ;;  %v1917_v17 = vld [vmem:[#allocation2 + $0x1f8] ss:$12 sps:$4 sm:$0xff]  }
  0x22   :  { %575 = vmatpush1.bf16.msra.mxu1 %v1905_v9  ;;  %v1909_v11 = vld [vmem:[#allocation2 + $0x214] ss:$12 sps:$4 sm:$0xff]   ;;  %v1897_v13 = vld [vmem:[#allocation2 + $0x4c] ss:$12 sps:$4 sm:$0xff]   ;;  %v1915_v15 = vld [vmem:[#allocation2 + $0x1fc] ss:$12 sps:$4 sm:$0xff]  }
  0x23   :  { %536 = vmatpush1.bf16.msra.mxu0 %v1890_v4  ;;  %576 = vmatprep.subr.bf16.mxu1 %v1909_v11  ;;  %v1900_v16 = vld [vmem:[#allocation2 + $0x34] ss:$12 sps:$4 sm:$0xff]   ;;  %v1921_v18 = vld [vmem:[#allocation2 + $0x1e4] ss:$12 sps:$4 sm:$0xff]   ;;  %v1906_v20 = vld [vmem:[#allocation2 + $0x1c] ss:$12 sps:$4 sm:$0xff]  }
  0x24   :  { %537 = vmatprep.subr.bf16.mxu0 %v1891_v5  ;;  %v1902_v19 = vld [vmem:[#allocation2 + $0x30] ss:$12 sps:$4 sm:$0xff]   ;;  %v1923_v21 = vld [vmem:[#allocation2 + $0x1e0] ss:$12 sps:$4 sm:$0xff]   ;;  %v1908_v23 = vld [vmem:[#allocation2 + $0x18] ss:$12 sps:$4 sm:$0xff]  }
  0x25   :  { %v1927_v22 = vld [vmem:[#allocation2 + $0x1cc] ss:$12 sps:$4 sm:$0xff]   ;;  %v1912_v24 = vld [vmem:[#allocation2 + $0x4] ss:$12 sps:$4 sm:$0xff]   ;;  %v1929_v25 = vld [vmem:[#allocation2 + $0x1c8] ss:$12 sps:$4 sm:$0xff]  }
  0x26   :  { %577 = vmatpush1.bf16.msra.mxu1 %v1911_v12  ;;  %v1933_v26 = vld [vmem:[#allocation2 + $0x1b4] ss:$12 sps:$4 sm:$0xff]   ;;  %v1918_v28 = vld [vmem:[#allocation2 + $0x16c] ss:$12 sps:$4 sm:$0xff]   ;;  %v1935_v29 = vld [vmem:[#allocation2 + $0x1b0] ss:$12 sps:$4 sm:$0xff]  }
  0x27   :  { %538 = vmatpush1.bf16.msra.mxu0 %v1893_v6  ;;  %578 = vmatprep.subr.bf16.mxu1 %v1915_v15  ;;  %v1914_v27 = vld [vmem:[#allocation2] ss:$12 sps:$4 sm:$0xff]   ;;  %v1939_v30 = vld [vmem:[#allocation2 + $0x19c] ss:$12 sps:$4 sm:$0xff]   ;;  %v1941_v32 = vld [vmem:[#allocation2 + $0x198] ss:$12 sps:$4 sm:$0xff]  }
  0x28   :  { %539 = vmatprep.subr.bf16.mxu0 %v1894_v7  ;;  %v1920_v31 = vld [vmem:[#allocation2 + $0x168] ss:$12 sps:$4 sm:$0xff]   ;;  %v1945_v34 = vld [vmem:[#allocation2 + $0x184] ss:$12 sps:$4 sm:$0xff]   ;;  %v1947_v37 = vld [vmem:[#allocation2 + $0x180] ss:$12 sps:$4 sm:$0xff]  }
  0x29   :  { %v1924_v33 = vld [vmem:[#allocation2 + $0x154] ss:$12 sps:$4 sm:$0xff]   ;;  %v1926_v35 = vld [vmem:[#allocation2 + $0x150] ss:$12 sps:$4 sm:$0xff]   ;;  %v48_v40 = vld [vmem:[%s2267_s0 + $0x8] sm:$0xff]  ;;  %v2124_v7 = vmov 0.0  }
  0x2a   :  { %579 = vmatpush1.bf16.msra.mxu1 %v1917_v17  ;;  %v1930_v36 = vld [vmem:[#allocation2 + $0x13c] ss:$12 sps:$4 sm:$0xff]   ;;  %v1932_v41 = vld [vmem:[#allocation2 + $0x138] ss:$12 sps:$4 sm:$0xff]   ;;  %v51_v44 = vpack.c.bf16 %v48_v40, %v48_v40  ;;  %v1938_v47 = vld [vmem:[#allocation2 + $0x120] ss:$12 sps:$4 sm:$0xff]  }
  0x2b   :  { %540 = vmatpush1.bf16.msra.mxu0 %v1896_v10  ;;  %580 = vmatprep.subr.bf16.mxu1 %v1921_v18  ;;  %v1951_v39 = vld [vmem:[#allocation2 + $0x170] ss:$12 sps:$4 sm:$0xff]   ;;  %v1956_v46 = vld [vmem:[#allocation2 + $0x158] ss:$12 sps:$4 sm:$0xff]   ;;  %v1961_v50 = vld [vmem:[#allocation2 + $0x140] ss:$12 sps:$4 sm:$0xff]  }
  0x2c   :  { %541 = vmatprep.subr.bf16.mxu0 %v1897_v13  ;;  %v1936_v42 = vld [vmem:[#allocation2 + $0x124] ss:$12 sps:$4 sm:$0xff]   ;;  %565 = vmatprep.mubr.bf16.mxu0 %v51_v44  ;;  %v1942_v48 = vld [vmem:[#allocation2 + $0x10c] ss:$12 sps:$4 sm:$0xff]   ;;  %v1944_v51 = vld [vmem:[#allocation2 + $0x108] ss:$12 sps:$4 sm:$0xff]  }
  0x2d   :  { %v1952_v45 = vld [vmem:[#allocation2 + $0xb0] ss:$12 sps:$4 sm:$0xff]   ;;  %v1957_v49 = vld [vmem:[#allocation2 + $0x98] ss:$12 sps:$4 sm:$0xff]   ;;  %v1948_v52 = vld [vmem:[#allocation2 + $0xf4] ss:$12 sps:$4 sm:$0xff]  }
  0x2e   :  { %581 = vmatpush1.bf16.msra.mxu1 %v1923_v21  ;;  %v1962_v53 = vld [vmem:[#allocation2 + $0x80] ss:$12 sps:$4 sm:$0xff]   ;;  %v1964_v54 = vld [vmem:[#allocation2 + $0x128] ss:$12 sps:$4 sm:$0xff]   ;;  %v1950_v55 = vld [vmem:[#allocation2 + $0xf0] ss:$12 sps:$4 sm:$0xff]  }
  0x2f   :  { %542 = vmatpush1.bf16.msra.mxu0 %v1899_v14  ;;  %582 = vmatprep.subr.bf16.mxu1 %v1927_v22  ;;  %v1953_v56 = vld [vmem:[#allocation2 + $0xdc] ss:$12 sps:$4 sm:$0xff]   ;;  %v1955_v59 = vld [vmem:[#allocation2 + $0xd8] ss:$12 sps:$4 sm:$0xff]   ;;  %v1960_v63 = vld [vmem:[#allocation2 + $0xc0] ss:$12 sps:$4 sm:$0xff]  }
  0x30   :  { %543 = vmatprep.subr.bf16.mxu0 %v1900_v16  ;;  %v1965_v57 = vld [vmem:[#allocation2 + $0x68] ss:$12 sps:$4 sm:$0xff]   ;;  %v1967_v58 = vld [vmem:[#allocation2 + $0x110] ss:$12 sps:$4 sm:$0xff]   ;;  %v1970_v62 = vld [vmem:[#allocation2 + $0xf8] ss:$12 sps:$4 sm:$0xff]  }
  0x31   :  { %v1958_v60 = vld [vmem:[#allocation2 + $0xc4] ss:$12 sps:$4 sm:$0xff]   ;;  %v1973_v2 = vld [vmem:[#allocation2 + $0xe0] ss:$12 sps:$4 sm:$0xff]   ;;  %v1976_v6 = vld [vmem:[#allocation2 + $0xc8] ss:$12 sps:$4 sm:$0xff]  }
  0x32   :  { %583 = vmatpush1.bf16.msra.mxu1 %v1929_v25  ;;  %v1968_v61 = vld [vmem:[#allocation2 + $0x50] ss:$12 sps:$4 sm:$0xff]   ;;  %v47_v0 = vld [vmem:[%s2267_s0] sm:$0xff]  ;;  %v1977_v9 = vld [vmem:[#allocation2 + $0x8] ss:$12 sps:$4 sm:$0xff]   ;;  %vm2125_vm0 = vmmov 0  }
  0x33   :  { %544 = vmatpush1.bf16.msra.mxu0 %v1902_v19  ;;  %584 = vmatprep.subr.bf16.mxu1 %v1933_v26  ;;  %v1971_v1 = vld [vmem:[#allocation2 + $0x38] ss:$12 sps:$4 sm:$0xff]   ;;  %v1963_v3 = vld [vmem:[#allocation2 + $0x230] ss:$12 sps:$4 sm:$0xff]   ;;  %v1974_v4 = vld [vmem:[#allocation2 + $0x20] ss:$12 sps:$4 sm:$0xff]   ;;  %v50_v5 = vpack.c.bf16 %v47_v0, %v47_v0 }
  0x34   :  { %545 = vmatprep.subr.bf16.mxu0 %v1906_v20  ;;  %v1966_v8 = vld [vmem:[#allocation2 + $0x218] ss:$12 sps:$4 sm:$0xff]   ;;  %v1969_v10 = vld [vmem:[#allocation2 + $0x200] ss:$12 sps:$4 sm:$0xff]   ;;  %v1972_v11 = vld [vmem:[#allocation2 + $0x1e8] ss:$12 sps:$4 sm:$0xff]   ;;  %v697_v20 = vlaneseq }
  0x35   :  { %v1975_v12 = vld [vmem:[#allocation2 + $0x1d0] ss:$12 sps:$4 sm:$0xff]   ;;  %v1978_v13 = vld [vmem:[#allocation2 + $0x1b8] ss:$12 sps:$4 sm:$0xff]   ;;  %v1979_v14 = vld [vmem:[#allocation2 + $0x1a0] ss:$12 sps:$4 sm:$0xff]  }
  0x36   :  { %585 = vmatpush1.bf16.msra.mxu1 %v1935_v29  ;;  %v1980_v15 = vld [vmem:[#allocation2 + $0x188] ss:$12 sps:$4 sm:$0xff]   ;;  %v698_v21 = vshrl.u32 %v697_v20, 7  ;;  %s2126_s20 = smov [#allocation7]  }
  0x37   :  { %546 = vmatpush1.bf16.msra.mxu0 %v1908_v23  ;;  %586 = vmatprep.subr.bf16.mxu1 %v1939_v30  ;;  %v695_v23 = vld [vmem:[%s2270_s3] ss:$8 sm:$0x3]  ;;  %s1519_s21 = sshll.u32 %s2126_s20, 4  ;;  %s1520_s21 = int_to_ptr.vmem [resolvable:$true] %s1519_s21 }
  0x38   :  { %547 = vmatprep.subr.bf16.mxu0 %v1912_v24  ;;  %v699_v22 = vsub.s32 0, %v698_v21  ;;  %v703_v24 = vsub.s32 1, %v698_v21  ;;  %v1987_v0 = vld [vmem:[#allocation5 + $0x8] sm:$0xff]   ;;  %s2091_s22 = scalar_lea.vmem %s1520_s21, 128  ;;  %p2096_p11 = scmp.lt.s32.totalorder %s1520_s21, %s1520_s21 }
  0x39   :  { %p2092_p10 = scmp.ne.s32.totalorder %s1520_s21, %s2091_s22  ;;  %p2097_p12 = scmp.lt.s32.totalorder %s2091_s22, %s2091_s22 }
  0x3a   :  { %587 = vmatpush1.bf16.msra.mxu1 %v1941_v32  ;;  %v700_v25 = vrot.slane %v695_v23, %v699_v22 }
  0x3b   :  { %548 = vmatpush1.bf16.msra.mxu0 %v1914_v27  ;;  %588 = vmatprep.subr.bf16.mxu1 %v1945_v34  ;;  %p2098_p13 = por %p2097_p12, %p2096_p11 }
  0x3c   :  { %549 = vmatprep.subr.bf16.mxu0 %v1918_v28  ;;  %v704_v28 = vrot.slane %v695_v23, %v703_v24  ;;  %v1990_v24 = vld [vmem:[#allocation5 + $0x78] sm:$0xff]  }
  0x3d   :  { %p2099_p0 = pnand %p2098_p13, %p2092_p10 }
  0x3e   :  { %589 = vmatpush1.bf16.msra.mxu1 %v1947_v37 }
  0x3f   :  { %550 = vmatpush2.bf16.msra.mxu0 %v1920_v31  ;;  %1657 = vmatprep.subr.bf16.mxu1 %v1951_v39 }
  0x40   :  { %551 = vmatprep.subr.bf16.mxu0 %v1924_v33 }
  0x41   :  { %607 = vmatmul.mubr.bf16.vlgmr.msra.gmra.mxu1 %v2164_v43 }
  0x42   :  { %1658 = vmatpush3.bf16.msra.mxu1 %v1952_v45  ;;  %647 = vmatprep.mubr.bf16.mxu1 %v51_v44 }
  0x43   :  { %552 = vmatpush2.bf16.msra.mxu0 %v1926_v35  ;;  %1659 = vmatprep.subr.bf16.mxu1 %v1956_v46 }
  0x44   :  { %553 = vmatprep.subr.bf16.mxu0 %v1930_v36 }
  0x46   :  { %1660 = vmatpush3.bf16.msra.mxu1 %v1957_v49  ;;  %v731_v49 = vld [vmem:[%s2270_s3 + $0x1] ss:$0 sm:$0xff] }
  0x47   :  { %554 = vmatpush2.bf16.msra.mxu0 %v1932_v41  ;;  %1661 = vmatprep.subr.bf16.mxu1 %v1961_v50 }
  0x48   :  { %555 = vmatprep.subr.bf16.mxu0 %v1936_v42 }
  0x4a   :  { %1662 = vmatpush3.bf16.msra.mxu1 %v1962_v53 }
  0x4b   :  { %556 = vmatpush2.bf16.msra.mxu0 %v1938_v47  ;;  %1663 = vmatprep.subr.bf16.mxu1 %v1964_v54 }
  0x4c   :  { %557 = vmatprep.subr.bf16.mxu0 %v1942_v48 }
  0x4e   :  { %1664 = vmatpush3.bf16.msra.mxu1 %v1965_v57 }
  0x4f   :  { %558 = vmatpush2.bf16.msra.mxu0 %v1944_v51  ;;  %1665 = vmatprep.subr.bf16.mxu1 %v1967_v58  ;;  %v1981_v51 = vld [vmem:[#allocation5 + $0x38] sm:$0xff]  }
  0x50   :  { %559 = vmatprep.subr.bf16.mxu0 %v1948_v52 }
  0x52   :  { %1666 = vmatpush3.bf16.msra.mxu1 %v1968_v61  ;;  %v1984_v61 = vld [vmem:[#allocation5 + $0x20] sm:$0xff]  }
  0x53   :  { %560 = vmatpush2.bf16.msra.mxu0 %v1950_v55  ;;  %1667 = vmatprep.subr.bf16.mxu1 %v1970_v62  ;;  %v1985_v62 = vld [vmem:[#allocation5 + $0x18] sm:$0xff]  }
  0x54   :  { %561 = vmatprep.subr.bf16.mxu0 %v1953_v56 }
  0x56   :  { %1668 = vmatpush3.bf16.msra.mxu1 %v1971_v1  ;;  %v1988_v1 = vld [vmem:[#allocation5] sm:$0xff]  }
  0x57   :  { %562 = vmatpush2.bf16.msra.mxu0 %v1955_v59  ;;  %1669 = vmatprep.subr.bf16.mxu1 %v1973_v2  ;;  %v1982_v59 = vld [vmem:[#allocation5 + $0x30] sm:$0xff]   ;;  %v1989_v2 = vld [vmem:[#allocation5 + $0xb8] sm:$0xff]  }
  0x58   :  { %563 = vmatprep.subr.bf16.mxu0 %v1958_v60  ;;  %v1983_v60 = vld [vmem:[#allocation5 + $0x28] sm:$0xff]  }
  0x5a   :  { %1670 = vmatpush3.bf16.msra.mxu1 %v1974_v4 }
  0x5b   :  { %564 = vmatpush2.bf16.msra.mxu0 %v1960_v63  ;;  %1671 = vmatprep.subr.bf16.mxu1 %v1976_v6  ;;  %v1986_v63 = vld [vmem:[#allocation5 + $0x10] sm:$0xff]  }
  0x5c   :  { %1755 = vmatprep.subr.bf16.mxu0 %v2124_v7 }
  0x5e   :  { %566 = vmatmul.mubr.bf16.vlgmr.msra.gmra.mxu0 %v50_v5  ;;  %1672 = vmatpush3.bf16.msra.mxu1 %v1977_v9 }
  0x5f   :  { %1756 = vmatpush3.bf16.msra.mxu0 %v1963_v3  ;;  %1771 = vmatprep.mubr.msk.bf16.mxu0 %vm2125_vm0, %v2124_v7 }
  0x60   :  { %1757 = vmatprep.subr.bf16.mxu0 %v2124_v7  ;;  %1775 = vmatprep.subr.bf16.mxu1 %v2124_v7 }
  0x61   :  { %648 = vmatmul.mubr.bf16.vlgmr.msra.gmra.mxu1 %v50_v5 }
  0x62   :  { %1791 = vmatprep.mubr.msk.bf16.mxu1 %vm2125_vm0, %v2124_v7  ;;  %1776 = vmatpush3.bf16.msra.mxu1 %v1981_v51 }
  0x63   :  { %1758 = vmatpush3.bf16.msra.mxu0 %v1966_v8  ;;  %1777 = vmatprep.subr.bf16.mxu1 %v2124_v7 }
  0x64   :  { %1759 = vmatprep.subr.bf16.mxu0 %v2124_v7 }
  0x66   :  { %1778 = vmatpush3.bf16.msra.mxu1 %v1982_v59 }
  0x67   :  { %1760 = vmatpush3.bf16.msra.mxu0 %v1969_v10  ;;  %1779 = vmatprep.subr.bf16.mxu1 %v2124_v7 }
  0x68   :  { %1761 = vmatprep.subr.bf16.mxu0 %v2124_v7 }
  0x6a   :  { %1780 = vmatpush3.bf16.msra.mxu1 %v1983_v60 }
  0x6b   :  { %1762 = vmatpush3.bf16.msra.mxu0 %v1972_v11  ;;  %1781 = vmatprep.subr.bf16.mxu1 %v2124_v7 }
  0x6c   :  { %1763 = vmatprep.subr.bf16.mxu0 %v2124_v7 }
  0x6e   :  { %1782 = vmatpush3.bf16.msra.mxu1 %v1984_v61 }
  0x6f   :  { %1764 = vmatpush3.bf16.msra.mxu0 %v1975_v12  ;;  %1783 = vmatprep.subr.bf16.mxu1 %v2124_v7 }
  0x70   :  { %1765 = vmatprep.subr.bf16.mxu0 %v2124_v7 }
  0x72   :  { %1784 = vmatpush3.bf16.msra.mxu1 %v1985_v62  ;;  %v2011_v62 = vld [vmem:[#allocation5 + $0xc8] sm:$0xff]  }
  0x73   :  { %1766 = vmatpush3.bf16.msra.mxu0 %v1978_v13  ;;  %1785 = vmatprep.subr.bf16.mxu1 %v2124_v7 }
  0x74   :  { %1767 = vmatprep.subr.bf16.mxu0 %v2124_v7 }
  0x76   :  { %1786 = vmatpush3.bf16.msra.mxu1 %v1986_v63 }
  0x77   :  { %1768 = vmatpush3.bf16.msra.mxu0 %v1979_v14  ;;  %1787 = vmatprep.subr.bf16.mxu1 %v2124_v7 }
  0x78   :  { %1769 = vmatprep.subr.bf16.mxu0 %v2124_v7 }
  0x7a   :  { %1788 = vmatpush3.bf16.msra.mxu1 %v1987_v0 }
  0x7b   :  { %1770 = vmatpush3.bf16.msra.mxu0 %v1980_v15  ;;  %1789 = vmatprep.subr.bf16.mxu1 %v2124_v7 }
  0x7c   :  { %1795 = vmatprep.subr.bf16.mxu0 %v2124_v7 }
  0x7e   :  { %1772 = vmatmul.mubr.bf16.vlgmr.msra.gmra.mxu0 %v2164_v43  ;;  %1790 = vmatpush3.bf16.msra.mxu1 %v1988_v1  ;;  %v2012_v1 = vld [vmem:[#allocation5 + $0xc0] sm:$0xff]  }
  0x7f   :  { %1811 = vmatprep.mubr.msk.bf16.mxu0 %vm2125_vm0, %v2124_v7  ;;  %1706 = vmatprep.subr.bf16.mxu1 %v1989_v2 }
 0x101   :  { %v608_v16 = vpop.f32.mrf.mxu1 }
 0x103   :  { %v610_v17 = vpop.f32.mrf.mxu1 }
 0x105   :  { %v612_v18 = vpop.f32.mrf.mxu1 }
 0x107   :  { %v613_v19 = vpop.f32.mrf.mxu1 }
 0x11e   :  { %v567_v26 = vpop.f32.mrf.mxu0 }
 0x11f   :  { %v609_v27 = vadd.f32 %v608_v16, %v567_v26  ;;  %v1991_v26 = vld [vmem:[#allocation5 + $0xb0] sm:$0xff]  }
 0x120   :  { %v569_v29 = vpop.f32.mrf.mxu0 }
 0x121   :  { %v707_v30 = vadd.f32 %v700_v25, %v609_v27  ;;  %v611_v31 = vadd.f32 %v610_v17, %v569_v29  ;;  %v1673_v37 = vpop.f32.mrf.mxu1  ;;  %v1993_v29 = vld [vmem:[#allocation5 + $0xa8] sm:$0xff]  }
 0x122   :  { %v571_v32 = vpop.f32.mrf.mxu0 }
 0x123   :  { %v709_v33 = vmul.f32 0.2, %v707_v30  ;;  %v708_v34 = vadd.f32 %v704_v28, %v611_v31  ;;  %v1674_v40 = vpop.f32.mrf.mxu1  ;;  %v1992_v28 = vld [vmem:[#allocation5 + $0x70] sm:$0xff]   ;;  %v1995_v31 = vld [vmem:[#allocation5 + $0xa0] sm:$0xff]  }
 0x124   :  { %v572_v35 = vpop.f32.mrf.mxu0  ;;  %v1675_v47 = vadd.f32 %v1674_v40, %v1673_v37  ;;  %v1996_v32 = vld [vmem:[#allocation5 + $0x60] sm:$0xff]   ;;  %v2001_v37 = vld [vmem:[#allocation5 + $0x88] sm:$0xff]  }
 0x125   :  { %v710_v36 = vmul.f32 0.2, %v708_v34  ;;  %v2190_v38 = vmax.f32 %v707_v30, %v709_v33  ;;  %v1676_v43 = vpop.f32.mrf.mxu1  ;;  %v1994_v30 = vld [vmem:[#allocation5 + $0x68] sm:$0xff]   ;;  %v1997_v33 = vld [vmem:[#allocation5 + $0x98] sm:$0xff]   ;;  %v1999_v35 = vld [vmem:[#allocation5 + $0x90] sm:$0xff]  }
 0x126   :  { %v2003_v40 = vld [vmem:[#allocation5 + $0x80] sm:$0xff]  }
 0x127   :  { %v2192_v39 = vmax.f32 %v708_v34, %v710_v36  ;;  %v716_v44 = vmul.f32 %v2190_v38, %v2190_v38  ;;  %v1677_v45 = vpop.f32.mrf.mxu1  ;;  %v1998_v34 = vld [vmem:[#allocation5 + $0x58] sm:$0xff]   ;;  %v2000_v36 = vld [vmem:[#allocation5 + $0x50] sm:$0xff]  }
 0x128   :  { %v2005_v45 = vld [vmem:[#allocation5 + $0xf8] sm:$0xff]  }
 0x129   :  { %v713_v41 = vadd.f32 %v2192_v39, %v2190_v38  ;;  %v717_v42 = vmul.f32 %v2192_v39, %v2192_v39  ;;  %1796 = vmatpush3.bf16.msra.mxu0 %v2005_v45  ;;  %v1178_v45 = vld [vmem:[%s2270_s3 + $0x4] ss:$0 sm:$0xff] }
 0x12a   :  { %1797 = vmatprep.subr.bf16.mxu0 %v2124_v7 }
 0x12b   :  { %714 = vadd.xlane.f32.xlu1 %v713_v41  ;;  %v718_v46 = vadd.f32 %v717_v42, %v716_v44  ;;  %v2004_v42 = vld [vmem:[#allocation5 + $0x40] sm:$0xff]  }
 0x12f   :  { %719 = vadd.xlane.f32.xlu1 %v718_v46 }
 0x13e   :  { %v689_v48 = vpop.f32.mrf.mxu0 }
 0x13f   :  { %v690_v50 = vadd.f32 %v1675_v47, %v689_v48 }
 0x140   :  { %v1773_v52 = vpop.f32.mrf.mxu0 }
 0x141   :  { %v732_v53 = vadd.f32 %v731_v49, %v690_v50 }
 0x142   :  { %v692_v54 = vpop.f32.mrf.mxu0 }
 0x143   :  { %v733_v55 = vmul.f32 0.2, %v732_v53  ;;  %v2006_v54 = vld [vmem:[#allocation5 + $0xf0] sm:$0xff]  }
 0x144   :  { %v1774_v56 = vpop.f32.mrf.mxu0  ;;  %1798 = vmatpush3.bf16.msra.mxu0 %v2006_v54  ;;  %v2023_v54 = vld [vmem:[#allocation5 + $0x168] sm:$0xff]  }
 0x145   :  { %v734_v57 = vmax.f32 %v732_v53, %v733_v55  ;;  %1799 = vmatprep.subr.bf16.mxu0 %v2124_v7  ;;  %v2007_v55 = vld [vmem:[#allocation5 + $0xe8] sm:$0xff]   ;;  %v2008_v56 = vld [vmem:[#allocation5 + $0xe0] sm:$0xff]  }
 0x147   :  { %735 = vadd.xlane.f32.xlu0 %v734_v57  ;;  %v737_v58 = vmul.f32 %v734_v57, %v734_v57 }
 0x148   :  { %1800 = vmatpush3.bf16.msra.mxu0 %v2007_v55  ;;  %v2024_v55 = vld [vmem:[#allocation5 + $0x160] sm:$0xff]  }
 0x149   :  { %1801 = vmatprep.subr.bf16.mxu0 %v2124_v7 }
 0x14b   :  { %738 = vadd.xlane.f32.xlu0 %v737_v58  ;;  %v2010_v58 = vld [vmem:[#allocation5 + $0xd0] sm:$0xff]  }
 0x14c   :  { %1802 = vmatpush3.bf16.msra.mxu0 %v2008_v56  ;;  %v2025_v56 = vld [vmem:[#allocation5 + $0x158] sm:$0xff]  }
 0x14d   :  { %1803 = vmatprep.subr.bf16.mxu0 %v2124_v7 }
 0x1b4   :  { %v715_v3 = vpop.xlane.xlu1 %714 }
 0x1b5   :  { %v721_v4 = vmul.f32 0.00390625, %v715_v3 }
 0x1b7   :  { %v722_v5 = vmul.f32 %v721_v4, %v715_v3  ;;  %v728_v19 = vsub.f32 %v2192_v39, %v721_v4  ;;  %v2002_v39 = vld [vmem:[#allocation5 + $0x48] sm:$0xff]   ;;  %v727_v41 = vsub.f32 %v2190_v38, %v721_v4  ;;  %v765_v38 = vld [vmem:[%s2270_s3 + $0x2] ss:$0 sm:$0xff] }
 0x1b8   :  { %v720_v6 = vpop.xlane.xlu1 %719 }
 0x1b9   :  { %v723_v8 = vsub.f32 %v720_v6, %v722_v5 }
 0x1bb   :  { %v724_v9 = vmul.f32 0.003921569, %v723_v8 }
 0x1bd   :  { %v725_v13 = vadd.f32 1e-06, %v724_v9 }
 0x1bf   :  { %2037 = vrsqrt.f32 %v725_v13 }
 0x1cc   :  { %v2038_v18 = vpop.eup %2037 }
 0x1cd   :  { %v730_v22 = vmul.f32 %v2038_v18, %v728_v19  ;;  %v729_v43 = vmul.f32 %v2038_v18, %v727_v41 }
 0x1cf   :  { %v870_v27 = vpack.c.bf16 %v730_v22, %v730_v22  ;;  %v869_v44 = vpack.c.bf16 %v729_v43, %v729_v43 }
 0x1d0   :  { %v736_v10 = vpop.xlane.xlu0 %735 }
 0x1d1   :  { %v740_v11 = vmul.f32 0.0078125, %v736_v10 }
 0x1d3   :  { %v741_v12 = vmul.f32 %v740_v11, %v736_v10  ;;  %v746_v20 = vsub.f32 %v734_v57, %v740_v11  ;;  %v2009_v57 = vld [vmem:[#allocation5 + $0xd8] sm:$0xff]  }
 0x1d4   :  { %v739_v14 = vpop.xlane.xlu0 %738  ;;  %1804 = vmatpush3.bf16.msra.mxu0 %v2009_v57  ;;  %v2026_v57 = vld [vmem:[#allocation5 + $0x150] sm:$0xff]  }
 0x1d5   :  { %v742_v15 = vsub.f32 %v739_v14, %v741_v12  ;;  %1805 = vmatprep.subr.bf16.mxu0 %v2124_v7  ;;  %v2013_v14 = vld [vmem:[#allocation5 + $0x138] sm:$0xff]  }
 0x1d7   :  { %v743_v16 = vmul.f32 0.007874016, %v742_v15 }
 0x1d8   :  { %1806 = vmatpush3.bf16.msra.mxu0 %v2010_v58  ;;  %v2027_v58 = vld [vmem:[#allocation5 + $0x148] sm:$0xff]  }
 0x1d9   :  { %v744_v17 = vadd.f32 1e-06, %v743_v16  ;;  %1807 = vmatprep.subr.bf16.mxu0 %v2124_v7  ;;  %v1144_v16 = vld [vmem:[%s2270_s3 + $0x3] ss:$0 sm:$0xff] }
 0x1db   :  { %2039 = vrsqrt.f32 %v744_v17 }
 0x1dc   :  { %1808 = vmatpush3.bf16.msra.mxu0 %v2011_v62 }
 0x1dd   :  { %1809 = vmatprep.subr.bf16.mxu0 %v2124_v7 }
 0x1e0   :  { %1810 = vmatpush3.bf16.msra.mxu0 %v2012_v1 }
 0x1e1   :  { %1815 = vmatprep.subr.bf16.mxu0 %v2124_v7 }
 0x1e8   :  { %v2040_v21 = vpop.eup %2039 }
 0x1e9   :  { %v747_v23 = vmul.f32 %v2040_v21, %v746_v20 }
 0x1eb   :  { %v748_v25 = vpack.c.bf16 %v747_v23, %v747_v23 }
 0x1ed   :  { %1792 = vmatmul.mubr.bf16.vlgmr.msra.gmra.mxu1 %v748_v25  ;;  %v2014_v25 = vld [vmem:[#allocation5 + $0x130] sm:$0xff]  }
 0x1ee   :  { %1707 = vmatpush3.bf16.msra.mxu1 %v1990_v24  ;;  %1136 = vmatprep.mubr.bf16.mxu1 %v870_v27  ;;  %v2016_v27 = vld [vmem:[#allocation5 + $0x120] sm:$0xff]  }
 0x1ef   :  { %1708 = vmatprep.subr.bf16.mxu1 %v1991_v26  ;;  %v2015_v26 = vld [vmem:[#allocation5 + $0x128] sm:$0xff]  }
 0x1f2   :  { %1709 = vmatpush3.bf16.msra.mxu1 %v1992_v28  ;;  %v2017_v28 = vld [vmem:[#allocation5 + $0x118] sm:$0xff]  }
 0x1f3   :  { %1710 = vmatprep.subr.bf16.mxu1 %v1993_v29  ;;  %v2018_v29 = vld [vmem:[#allocation5 + $0x110] sm:$0xff]  }
 0x1f6   :  { %1711 = vmatpush3.bf16.msra.mxu1 %v1994_v30  ;;  %v2019_v30 = vld [vmem:[#allocation5 + $0x108] sm:$0xff]  }
 0x1f7   :  { %1712 = vmatprep.subr.bf16.mxu1 %v1995_v31  ;;  %v2020_v31 = vld [vmem:[#allocation5 + $0x100] sm:$0xff]  }
 0x1fa   :  { %1713 = vmatpush3.bf16.msra.mxu1 %v1996_v32 }
 0x1fb   :  { %1714 = vmatprep.subr.bf16.mxu1 %v1997_v33 }
 0x1fe   :  { %1715 = vmatpush3.bf16.msra.mxu1 %v1998_v34 }
 0x1ff   :  { %1716 = vmatprep.subr.bf16.mxu1 %v1999_v35 }
 0x202   :  { %1717 = vmatpush3.bf16.msra.mxu1 %v2000_v36 }
 0x203   :  { %1718 = vmatprep.subr.bf16.mxu1 %v2001_v37 }
 0x206   :  { %1719 = vmatpush3.bf16.msra.mxu1 %v2002_v39 }
 0x207   :  { %1720 = vmatprep.subr.bf16.mxu1 %v2003_v40 }
 0x20a   :  { %1721 = vmatpush3.bf16.msra.mxu1 %v2004_v42 }
 0x20b   :  { %1835 = vmatprep.subr.bf16.mxu1 %v2124_v7 }
 0x20d   :  { %1137 = vmatmul.mubr.bf16.vlgmr.msra.gmra.mxu1 %v869_v44  ;;  %v2021_v44 = vld [vmem:[#allocation5 + $0x178] sm:$0xff]  }
 0x20e   :  { %1851 = vmatprep.mubr.msk.bf16.mxu1 %vm2125_vm0, %v2124_v7  ;;  %1836 = vmatpush3.bf16.msra.mxu1 %v2021_v44 }
 0x20f   :  { %1837 = vmatprep.subr.bf16.mxu1 %v2124_v7 }
 0x2ad   :  { %v848_v46 = vpop.f32.mrf.mxu1 }
 0x2ae   :  { %v849_v47 = vadd.f32 %v848_v46, %v765_v38 }
 0x2af   :  { %v1793_v48 = vpop.f32.mrf.mxu1 }
 0x2b0   :  { %v854_v49 = vmul.f32 0.2, %v849_v47 }
 0x2b1   :  { %v851_v50 = vpop.f32.mrf.mxu1 }
 0x2b2   :  { %v855_v51 = vmax.f32 %v849_v47, %v854_v49 }
 0x2b3   :  { %v1794_v52 = vpop.f32.mrf.mxu1 }
 0x2b4   :  { %856 = vadd.xlane.f32.xlu0 %v855_v51  ;;  %v858_v53 = vmul.f32 %v855_v51, %v855_v51 }
 0x2b6   :  { %859 = vadd.xlane.f32.xlu1 %v858_v53  ;;  %v2022_v53 = vld [vmem:[#allocation5 + $0x170] sm:$0xff]  }
 0x2b7   :  { %1838 = vmatpush3.bf16.msra.mxu1 %v2022_v53 }
 0x2b8   :  { %1839 = vmatprep.subr.bf16.mxu1 %v2124_v7 }
 0x2bb   :  { %1840 = vmatpush3.bf16.msra.mxu1 %v2023_v54 }
 0x2bc   :  { %1841 = vmatprep.subr.bf16.mxu1 %v2124_v7 }
 0x2bf   :  { %1842 = vmatpush3.bf16.msra.mxu1 %v2024_v55 }
 0x2c0   :  { %1843 = vmatprep.subr.bf16.mxu1 %v2124_v7 }
 0x2c3   :  { %1844 = vmatpush3.bf16.msra.mxu1 %v2025_v56 }
 0x2c4   :  { %1845 = vmatprep.subr.bf16.mxu1 %v2124_v7 }
 0x2c7   :  { %1846 = vmatpush3.bf16.msra.mxu1 %v2026_v57 }
 0x2c8   :  { %1847 = vmatprep.subr.bf16.mxu1 %v2124_v7 }
 0x2cb   :  { %1848 = vmatpush3.bf16.msra.mxu1 %v2027_v58 }
 0x2cc   :  { %1849 = vmatprep.subr.bf16.mxu1 %v2124_v7 }
 0x2cd   :  { %v1722_v59 = vpop.f32.mrf.mxu1 }
 0x2cf   :  { %v1723_v60 = vpop.f32.mrf.mxu1 }
 0x2d0   :  { %v1724_v61 = vadd.f32 %v1723_v60, %v1722_v59  ;;  %v2028_v59 = vld [vmem:[#allocation5 + $0x140] sm:$0xff]  }
 0x2d1   :  { %v1725_v63 = vpop.f32.mrf.mxu1  ;;  %1850 = vmatpush3.bf16.msra.mxu1 %v2028_v59 }
 0x2d3   :  { %v1726_v0 = vpop.f32.mrf.mxu1 }
 0x33d   :  { %v857_v2 = vpop.xlane.xlu0 %856 }
 0x33e   :  { %v861_v3 = vmul.f32 0.0078125, %v857_v2 }
 0x33f   :  { %v860_v5 = vpop.xlane.xlu1 %859 }
 0x340   :  { %v862_v4 = vmul.f32 %v861_v3, %v857_v2  ;;  %v867_v10 = vsub.f32 %v855_v51, %v861_v3 }
 0x342   :  { %v863_v6 = vsub.f32 %v860_v5, %v862_v4 }
 0x344   :  { %v864_v8 = vmul.f32 0.007874016, %v863_v6 }
 0x346   :  { %v865_v9 = vadd.f32 1e-06, %v864_v8  ;;  %v2029_v8 = vld [vmem:[#allocation5 + $0x1b8] sm:$0xff]  }
 0x348   :  { %2041 = vrsqrt.f32 %v865_v9  ;;  %v1299_v9 = vld [vmem:[%s2270_s3 + $0x5] ss:$0 sm:$0xff] }
 0x355   :  { %v2042_v11 = vpop.eup %2041 }
 0x356   :  { %v868_v12 = vmul.f32 %v2042_v11, %v867_v10 }
 0x358   :  { %v903_v13 = vpack.c.bf16 %v868_v12, %v868_v12 }
 0x35a   :  { %1812 = vmatmul.mubr.bf16.vlgmr.msra.gmra.mxu0 %v903_v13 }
 0x35b   :  { %1831 = vmatprep.mubr.msk.bf16.mxu0 %vm2125_vm0, %v2124_v7  ;;  %1816 = vmatpush3.bf16.msra.mxu0 %v2013_v14 }
 0x35c   :  { %1817 = vmatprep.subr.bf16.mxu0 %v2124_v7 }
 0x35f   :  { %1818 = vmatpush3.bf16.msra.mxu0 %v2014_v25 }
 0x360   :  { %1819 = vmatprep.subr.bf16.mxu0 %v2124_v7 }
 0x363   :  { %1820 = vmatpush3.bf16.msra.mxu0 %v2015_v26 }
 0x364   :  { %1821 = vmatprep.subr.bf16.mxu0 %v2124_v7 }
 0x367   :  { %1822 = vmatpush3.bf16.msra.mxu0 %v2016_v27 }
 0x368   :  { %1823 = vmatprep.subr.bf16.mxu0 %v2124_v7 }
 0x36b   :  { %1824 = vmatpush3.bf16.msra.mxu0 %v2017_v28 }
 0x36c   :  { %1825 = vmatprep.subr.bf16.mxu0 %v2124_v7 }
 0x36f   :  { %1826 = vmatpush3.bf16.msra.mxu0 %v2018_v29 }
 0x370   :  { %1827 = vmatprep.subr.bf16.mxu0 %v2124_v7 }
 0x373   :  { %1828 = vmatpush3.bf16.msra.mxu0 %v2019_v30 }
 0x374   :  { %1829 = vmatprep.subr.bf16.mxu0 %v2124_v7 }
 0x377   :  { %1830 = vmatpush3.bf16.msra.mxu0 %v2020_v31 }
 0x378   :  { %1855 = vmatprep.subr.bf16.mxu0 %v2124_v7 }
 0x41a   :  { %v1002_v15 = vpop.f32.mrf.mxu0 }
 0x41b   :  { %v1139_v17 = vadd.f32 %v1724_v61, %v1002_v15 }
 0x41c   :  { %v1813_v18 = vpop.f32.mrf.mxu0 }
 0x41d   :  { %v1145_v19 = vadd.f32 %v1144_v16, %v1139_v17  ;;  %v2030_v18 = vld [vmem:[#allocation5 + $0x1b0] sm:$0xff]  }
 0x41e   :  { %v1005_v20 = vpop.f32.mrf.mxu0 }
 0x41f   :  { %v1146_v21 = vmul.f32 0.2, %v1145_v19  ;;  %v2032_v20 = vld [vmem:[#allocation5 + $0x1a0] sm:$0xff]  }
 0x420   :  { %v1814_v22 = vpop.f32.mrf.mxu0 }
 0x421   :  { %v1147_v23 = vmax.f32 %v1145_v19, %v1146_v21  ;;  %v2031_v19 = vld [vmem:[#allocation5 + $0x1a8] sm:$0xff]   ;;  %v2033_v21 = vld [vmem:[#allocation5 + $0x198] sm:$0xff]   ;;  %v2034_v22 = vld [vmem:[#allocation5 + $0x190] sm:$0xff]  }
 0x423   :  { %1148 = vadd.xlane.f32.xlu0 %v1147_v23  ;;  %v1150_v24 = vmul.f32 %v1147_v23, %v1147_v23 }
 0x425   :  { %1151 = vadd.xlane.f32.xlu1 %v1150_v24  ;;  %v2036_v24 = vld [vmem:[#allocation5 + $0x180] sm:$0xff]  }
 0x4ac   :  { %v1149_v32 = vpop.xlane.xlu0 %1148 }
 0x4ad   :  { %v1153_v33 = vmul.f32 0.0078125, %v1149_v32 }
 0x4ae   :  { %v1152_v35 = vpop.xlane.xlu1 %1151 }
 0x4af   :  { %v1154_v34 = vmul.f32 %v1153_v33, %v1149_v32  ;;  %v1159_v40 = vsub.f32 %v1147_v23, %v1153_v33  ;;  %v2035_v23 = vld [vmem:[#allocation5 + $0x188] sm:$0xff]  }
 0x4b1   :  { %v1155_v36 = vsub.f32 %v1152_v35, %v1154_v34 }
 0x4b3   :  { %v1156_v37 = vmul.f32 0.007874016, %v1155_v36  ;;  %v1420_v36 = vld [vmem:[%s2270_s3 + $0x6] ss:$0 sm:$0xff] }
 0x4b5   :  { %v1157_v39 = vadd.f32 1e-06, %v1156_v37 }
 0x4b7   :  { %2043 = vrsqrt.f32 %v1157_v39 }
 0x4c4   :  { %v2044_v41 = vpop.eup %2043 }
 0x4c5   :  { %v1160_v42 = vmul.f32 %v2044_v41, %v1159_v40 }
 0x4c7   :  { %v1161_v43 = vpack.c.bf16 %v1160_v42, %v1160_v42 }
 0x4c9   :  { %1832 = vmatmul.mubr.bf16.vlgmr.msra.gmra.mxu0 %v1161_v43 }
 0x4ca   :  { %1871 = vmatprep.mubr.msk.bf16.mxu0 %vm2125_vm0, %v2124_v7  ;;  %1856 = vmatpush3.bf16.msra.mxu0 %v2029_v8 }
 0x4cb   :  { %1857 = vmatprep.subr.bf16.mxu0 %v2124_v7 }
 0x4ce   :  { %1858 = vmatpush3.bf16.msra.mxu0 %v2030_v18 }
 0x4cf   :  { %1859 = vmatprep.subr.bf16.mxu0 %v2124_v7 }
 0x4d2   :  { %1860 = vmatpush3.bf16.msra.mxu0 %v2031_v19 }
 0x4d3   :  { %1861 = vmatprep.subr.bf16.mxu0 %v2124_v7 }
 0x4d6   :  { %1862 = vmatpush3.bf16.msra.mxu0 %v2032_v20 }
 0x4d7   :  { %1863 = vmatprep.subr.bf16.mxu0 %v2124_v7 }
 0x4da   :  { %1864 = vmatpush3.bf16.msra.mxu0 %v2033_v21 }
 0x4db   :  { %1865 = vmatprep.subr.bf16.mxu0 %v2124_v7 }
 0x4de   :  { %1866 = vmatpush3.bf16.msra.mxu0 %v2034_v22 }
 0x4df   :  { %1867 = vmatprep.subr.bf16.mxu0 %v2124_v7 }
 0x4e2   :  { %1868 = vmatpush3.bf16.msra.mxu0 %v2035_v23 }
 0x4e3   :  { %1869 = vmatprep.subr.bf16.mxu0 %v2124_v7 }
 0x4e6   :  { %1870 = vmatpush3.bf16.msra.mxu0 %v2036_v24 }
 0x589   :  { %v1261_v38 = vpop.f32.mrf.mxu0 }
 0x58a   :  { %v1262_v46 = vadd.f32 %v1261_v38, %v1178_v45 }
 0x58b   :  { %v1833_v47 = vpop.f32.mrf.mxu0 }
 0x58c   :  { %v1267_v48 = vmul.f32 0.2, %v1262_v46 }
 0x58d   :  { %v1264_v49 = vpop.f32.mrf.mxu0 }
 0x58e   :  { %v1268_v50 = vmax.f32 %v1262_v46, %v1267_v48 }
 0x58f   :  { %v1834_v51 = vpop.f32.mrf.mxu0 }
 0x590   :  { %1269 = vadd.xlane.f32.xlu0 %v1268_v50  ;;  %v1271_v52 = vmul.f32 %v1268_v50, %v1268_v50 }
 0x592   :  { %1272 = vadd.xlane.f32.xlu1 %v1271_v52 }
 0x619   :  { %v1270_v60 = vpop.xlane.xlu0 %1269 }
 0x61a   :  { %v1274_v61 = vmul.f32 0.0078125, %v1270_v60 }
 0x61b   :  { %v1273_v63 = vpop.xlane.xlu1 %1272 }
 0x61c   :  { %v1275_v62 = vmul.f32 %v1274_v61, %v1270_v60  ;;  %v1280_v3 = vsub.f32 %v1268_v50, %v1274_v61 }
 0x61e   :  { %v1276_v0 = vsub.f32 %v1273_v63, %v1275_v62 }
 0x620   :  { %v1277_v1 = vmul.f32 0.007874016, %v1276_v0 }
 0x622   :  { %v1278_v2 = vadd.f32 1e-06, %v1277_v1 }
 0x624   :  { %2045 = vrsqrt.f32 %v1278_v2 }
 0x631   :  { %v2046_v4 = vpop.eup %2045 }
 0x632   :  { %v1281_v5 = vmul.f32 %v2046_v4, %v1280_v3 }
 0x634   :  { %v1282_v6 = vpack.c.bf16 %v1281_v5, %v1281_v5 }
 0x636   :  { %1852 = vmatmul.mubr.bf16.vlgmr.msra.gmra.mxu1 %v1282_v6 }
 0x6f6   :  { %v1382_v10 = vpop.f32.mrf.mxu1 }
 0x6f7   :  { %v1383_v11 = vadd.f32 %v1382_v10, %v1299_v9 }
 0x6f8   :  { %v1853_v12 = vpop.f32.mrf.mxu1 }
 0x6f9   :  { %v1388_v13 = vmul.f32 0.2, %v1383_v11 }
 0x6fa   :  { %v1385_v14 = vpop.f32.mrf.mxu1 }
 0x6fb   :  { %v1389_v15 = vmax.f32 %v1383_v11, %v1388_v13 }
 0x6fc   :  { %v1854_v16 = vpop.f32.mrf.mxu1 }
 0x6fd   :  { %1390 = vadd.xlane.f32.xlu0 %v1389_v15  ;;  %v1392_v17 = vmul.f32 %v1389_v15, %v1389_v15 }
 0x6ff   :  { %1393 = vadd.xlane.f32.xlu1 %v1392_v17 }
 0x786   :  { %v1391_v25 = vpop.xlane.xlu0 %1390 }
 0x787   :  { %v1395_v26 = vmul.f32 0.0078125, %v1391_v25 }
 0x788   :  { %v1394_v28 = vpop.xlane.xlu1 %1393 }
 0x789   :  { %v1396_v27 = vmul.f32 %v1395_v26, %v1391_v25  ;;  %v1401_v32 = vsub.f32 %v1389_v15, %v1395_v26 }
 0x78b   :  { %v1397_v29 = vsub.f32 %v1394_v28, %v1396_v27 }
 0x78d   :  { %v1398_v30 = vmul.f32 0.007874016, %v1397_v29 }
 0x78f   :  { %v1399_v31 = vadd.f32 1e-06, %v1398_v30 }
 0x791   :  { %2047 = vrsqrt.f32 %v1399_v31 }
 0x79e   :  { %v2048_v33 = vpop.eup %2047 }
 0x79f   :  { %v1402_v34 = vmul.f32 %v2048_v33, %v1401_v32 }
 0x7a1   :  { %v1403_v35 = vpack.c.bf16 %v1402_v34, %v1402_v34 }
 0x7a3   :  { %1872 = vmatmul.mubr.bf16.vlgmr.msra.gmra.mxu0 %v1403_v35 }
 0x863   :  { %v1503_v37 = vpop.f32.mrf.mxu0 }
 0x864   :  { %v1504_v7 = vadd.f32 %v1503_v37, %v1420_v36 }
 0x865   :  { %v1873_v39 = vpop.f32.mrf.mxu0 }
 0x866   :  { %2049 = vtanh.f32 %v1504_v7 }
 0x867   :  { %v1506_v40 = vpop.f32.mrf.mxu0 }
 0x869   :  { %v1874_v41 = vpop.f32.mrf.mxu0 }
 0x873   :  { %v2050_v42 = vpop.eup %2049 }
 0x874   :  { %v1510_v43 = vmul.f32 0.5, %v2050_v42 }
 0x876   :  { %v1511_v44 = vadd.f32 0.5, %v1510_v43 }
 0x878   :  { %1512 = vst [vmem:[#allocation7] sm:$0xff] %v1511_v44 }
 0x879   :  { %2102 = shalt.err (!%p2099_p0)
}
 0x87a   :  { %1522 = dma.vmem_to_hbm [thread:$0]  %s1520_s21, 128, %s2271_s4, [#allocation4]  }
 0x87b   :  { %2115 = dma.done.wait [#allocation4], 128  }
 0x87c   :  { %2116 = vsyncadd [#allocation4], 4294967168 }
 0x87d   :  { %1526 = vsyncpa [#allocation3], 1 }
 0x87e   :  { %1527 = vsyncpa [#allocation6], 1 }
 0x87f   :  { %1528 = vsyncpa [#allocation4], 1 }

</bundles_post_ra>
